<compile_context>
chip_gen: v7x
topology: tpu7x:2x2x1
jax: 0.10.0
libtpu: 0.0.40
codegen_flags: <defaults>
</compile_context>

<pallas_src>
import functools

import jax
import jax.numpy as jnp
from jax.experimental import pallas as pl
from jax.experimental.pallas import tpu as pltpu


def _round_up(x, m):
    return (x + m - 1) // m * m


def _mlp_kernel(n_layers, compute_dtype, *refs):
    # refs = (x_ref, w0, b0, w1, b1, ..., w_{L-1}, b_{L-1}, out_ref)
    x_ref = refs[0]
    out_ref = refs[-1]
    param_refs = refs[1:-1]

    h = x_ref[...].astype(jnp.float32)
    for i in range(n_layers):
        w = param_refs[2 * i][...]                            # (in_p, out_p), compute_dtype
        b = param_refs[2 * i + 1][...].astype(jnp.float32)    # (1, out_p), f32
        # bf16 MXU inputs, f32 accumulation; bias added in f32.
        h = jnp.dot(h.astype(compute_dtype), w,
                    preferred_element_type=jnp.float32) + b
        if i != n_layers - 1:
            h = h * jax.nn.sigmoid(h)                         # SiLU in f32

    # Numerically stable softmax over the (lane-padded) feature axis.
    # Padded logit lanes carry a -1e30 bias -> exp == 0 -> don't affect the sum.
    m = jnp.max(h, axis=-1, keepdims=True)
    e = jnp.exp(h - m)
    inv = pl.reciprocal(jnp.sum(e, axis=-1, keepdims=True), approx=True)
    out_ref[...] = (e * inv).astype(out_ref.dtype)


def mlp_forward(x, params, *, tile_b=256, compute_dtype=jnp.bfloat16):
    """x: (B, width[0]) f32; params: list of (W (in,out), b (1,out)) f32 pairs."""
    B, d_in = x.shape
    n_layers = len(params)
    widths = [d_in] + [w.shape[1] for w, _ in params]
    padded = [_round_up(w, 128) for w in widths]              # lane-align features

    # Pad + cast parameters (weights -> compute dtype once; biases stay f32).
    flat = []
    for i, (w, b) in enumerate(params):
        pin, pout = padded[i], padded[i + 1]
        w_p = jnp.zeros((pin, pout), compute_dtype)
        w_p = w_p.at[:w.shape[0], :w.shape[1]].set(w.astype(compute_dtype))
        # Padded lanes of the LAST layer must be masked out of the softmax.
        fill = -1e30 if i == n_layers - 1 else 0.0
        b_p = jnp.full((1, pout), fill, jnp.float32)
        b_p = b_p.at[:, :b.shape[1]].set(b.astype(jnp.float32))
        flat += [w_p, b_p]

    # Pad activations: batch -> multiple of tile_b (>= 8), features -> 128 lanes.
    tile_b = max(8, min(tile_b, _round_up(B, 8)))
    pb = _round_up(B, tile_b)
    x_p = jnp.zeros((pb, padded[0]), jnp.float32).at[:B, :d_in].set(x)

    grid = (pb // tile_b,)
    in_specs = [pl.BlockSpec((tile_b, padded[0]), lambda i: (i, 0))]
    for i in range(n_layers):
        pin, pout = padded[i], padded[i + 1]
        in_specs += [pl.BlockSpec((pin, pout), lambda *_: (0, 0)),   # W resident
                     pl.BlockSpec((1, pout), lambda *_: (0, 0))]     # b resident
    out_specs = pl.BlockSpec((tile_b, padded[-1]), lambda i: (i, 0))

    kernel = functools.partial(_mlp_kernel, n_layers, compute_dtype)
    out_p = pl.pallas_call(
        kernel,
        out_shape=jax.ShapeDtypeStruct((pb, padded[-1]), jnp.float32),
        grid=grid,
        in_specs=in_specs,
        out_specs=out_specs,
        compiler_params=pltpu.CompilerParams(
            dimension_semantics=("parallel",),          # megacore on v7x
            vmem_limit_bytes=48 * 1024 * 1024,          # headroom on v7x 64 MiB
        ),
    )(x_p, *flat)
    return out_p[:B, :widths[-1]]


def init_params(key, width):
    """Deterministic init mirroring nn.Linear shapes (stored transposed: (in, out))."""
    params = []
    for infeature, outfeature in zip(width[:-1], width[1:]):
        key, kw, kb = jax.random.split(key, 3)
        bound = 1.0 / (infeature ** 0.5)
        w = jax.random.uniform(kw, (infeature, outfeature), jnp.float32,
                               minval=-bound, maxval=bound)
        b = jax.random.uniform(kb, (1, outfeature), jnp.float32,
                               minval=-bound, maxval=bound)
        params.append((w, b))
    return params


def mlp_reference(x, params, compute_dtype=jnp.bfloat16):
    """Pure-JAX reference mirroring the kernel's bf16 matmul / f32 accumulation."""
    h = x
    for i, (w, b) in enumerate(params):
        h = jnp.dot(h.astype(compute_dtype), w.astype(compute_dtype),
                    preferred_element_type=jnp.float32) + b
        if i != len(params) - 1:
            h = h * jax.nn.sigmoid(h)
    return jax.nn.softmax(h, axis=-1)


if __name__ == "__main__":
    width = [16, 32, 32, 8]     # MLP(width=[16, 32, 32, 8])
    batch = 32                  # small demo; tile_b=8 -> 4 pipelined grid steps

    key = jax.random.PRNGKey(0)
    key, kx = jax.random.split(key)
    x = jax.random.normal(kx, (batch, width[0]), jnp.float32)
    params = init_params(key, width)

    out = mlp_forward(x, params, tile_b=8)
    out = jax.block_until_ready(out)

    ref = mlp_reference(x, params)
    assert out.shape == (batch, width[-1])
    assert jnp.allclose(out, ref, atol=1e-2, rtol=1e-2), "mismatch vs reference"
    assert jnp.allclose(jnp.sum(out, axis=-1), 1.0, atol=1e-2), "softmax rows must sum to ~1"

    print("KERNEL_OK")
</pallas_src>

<mosaic_0001>
module attributes {stable_mosaic.version = 11 : i64} {
  func.func @_mlp_kernel(%arg0: i32, %arg1: memref<8x128xf32, #tpu.memory_space<vmem>>, %arg2: memref<128x128xbf16, #tpu.memory_space<vmem>>, %arg3: memref<1x128xf32, #tpu.memory_space<vmem>>, %arg4: memref<128x128xbf16, #tpu.memory_space<vmem>>, %arg5: memref<1x128xf32, #tpu.memory_space<vmem>>, %arg6: memref<128x128xbf16, #tpu.memory_space<vmem>>, %arg7: memref<1x128xf32, #tpu.memory_space<vmem>>, %arg8: memref<8x128xf32, #tpu.memory_space<vmem>>) attributes {dimension_semantics = [#tpu.dimension_semantics<parallel>], iteration_bounds = array<i64: 4>, scalar_prefetch = 0 : i64, scratch_operands = 0 : i64, tpu.core_type = #tpu.core_type<tc>, window_params = [{transform_indices = @transform_0, window_bounds = array<i64: 8, 128>}, {pipeline_mode = #tpu.pipeline_mode<synchronous>, transform_indices = @transform_1, window_bounds = array<i64: 128, 128>}, {pipeline_mode = #tpu.pipeline_mode<synchronous>, transform_indices = @transform_2, window_bounds = array<i64: 1, 128>}, {pipeline_mode = #tpu.pipeline_mode<synchronous>, transform_indices = @transform_3, window_bounds = array<i64: 128, 128>}, {pipeline_mode = #tpu.pipeline_mode<synchronous>, transform_indices = @transform_4, window_bounds = array<i64: 1, 128>}, {pipeline_mode = #tpu.pipeline_mode<synchronous>, transform_indices = @transform_5, window_bounds = array<i64: 128, 128>}, {pipeline_mode = #tpu.pipeline_mode<synchronous>, transform_indices = @transform_6, window_bounds = array<i64: 1, 128>}, {transform_indices = @transform_7, window_bounds = array<i64: 8, 128>}]} {
    %c0 = arith.constant 0 : index
    %c0_0 = arith.constant 0 : index
    %0 = vector.load %arg1[%c0, %c0_0] : memref<8x128xf32, #tpu.memory_space<vmem>>, vector<8x128xf32>
    %c0_1 = arith.constant 0 : index
    %c0_2 = arith.constant 0 : index
    %1 = vector.load %arg2[%c0_1, %c0_2] : memref<128x128xbf16, #tpu.memory_space<vmem>>, vector<128x128xbf16>
    %c0_3 = arith.constant 0 : index
    %c0_4 = arith.constant 0 : index
    %2 = vector.load %arg3[%c0_3, %c0_4] : memref<1x128xf32, #tpu.memory_space<vmem>>, vector<1x128xf32>
    %3 = arith.truncf %0 : vector<8x128xf32> to vector<8x128xbf16>
    %cst = arith.constant dense<0.000000e+00> : vector<8x128xf32>
    %4 = tpu.matmul %3, %1, %cst {dimension_numbers = #tpu.dot_dimension_numbers<[1], [0], [0], [1], [0, 0, 1, 1], [], []>} : vector<8x128xbf16>, vector<128x128xbf16>, vector<8x128xf32> -> vector<8x128xf32>
    %5 = vector.broadcast %2 : vector<1x128xf32> to vector<8x128xf32>
    %6 = arith.addf %4, %5 : vector<8x128xf32>
    %7 = arith.negf %6 : vector<8x128xf32>
    %8 = math.exp %7 : vector<8x128xf32>
    %cst_5 = arith.constant 1.000000e+00 : f32
    %9 = vector.broadcast %cst_5 : f32 to vector<8x128xf32>
    %10 = arith.addf %9, %8 : vector<8x128xf32>
    %11 = arith.divf %9, %10 : vector<8x128xf32>
    %12 = arith.mulf %6, %11 : vector<8x128xf32>
    %c0_6 = arith.constant 0 : index
    %c0_7 = arith.constant 0 : index
    %13 = vector.load %arg4[%c0_6, %c0_7] : memref<128x128xbf16, #tpu.memory_space<vmem>>, vector<128x128xbf16>
    %c0_8 = arith.constant 0 : index
    %c0_9 = arith.constant 0 : index
    %14 = vector.load %arg5[%c0_8, %c0_9] : memref<1x128xf32, #tpu.memory_space<vmem>>, vector<1x128xf32>
    %15 = arith.truncf %12 : vector<8x128xf32> to vector<8x128xbf16>
    %cst_10 = arith.constant dense<0.000000e+00> : vector<8x128xf32>
    %16 = tpu.matmul %15, %13, %cst_10 {dimension_numbers = #tpu.dot_dimension_numbers<[1], [0], [0], [1], [0, 0, 1, 1], [], []>} : vector<8x128xbf16>, vector<128x128xbf16>, vector<8x128xf32> -> vector<8x128xf32>
    %17 = vector.broadcast %14 : vector<1x128xf32> to vector<8x128xf32>
    %18 = arith.addf %16, %17 : vector<8x128xf32>
    %19 = arith.negf %18 : vector<8x128xf32>
    %20 = math.exp %19 : vector<8x128xf32>
    %cst_11 = arith.constant 1.000000e+00 : f32
    %21 = vector.broadcast %cst_11 : f32 to vector<8x128xf32>
    %22 = arith.addf %21, %20 : vector<8x128xf32>
    %23 = arith.divf %21, %22 : vector<8x128xf32>
    %24 = arith.mulf %18, %23 : vector<8x128xf32>
    %c0_12 = arith.constant 0 : index
    %c0_13 = arith.constant 0 : index
    %25 = vector.load %arg6[%c0_12, %c0_13] : memref<128x128xbf16, #tpu.memory_space<vmem>>, vector<128x128xbf16>
    %c0_14 = arith.constant 0 : index
    %c0_15 = arith.constant 0 : index
    %26 = vector.load %arg7[%c0_14, %c0_15] : memref<1x128xf32, #tpu.memory_space<vmem>>, vector<1x128xf32>
    %27 = arith.truncf %24 : vector<8x128xf32> to vector<8x128xbf16>
    %cst_16 = arith.constant dense<0.000000e+00> : vector<8x128xf32>
    %28 = tpu.matmul %27, %25, %cst_16 {dimension_numbers = #tpu.dot_dimension_numbers<[1], [0], [0], [1], [0, 0, 1, 1], [], []>} : vector<8x128xbf16>, vector<128x128xbf16>, vector<8x128xf32> -> vector<8x128xf32>
    %29 = vector.broadcast %26 : vector<1x128xf32> to vector<8x128xf32>
    %30 = arith.addf %28, %29 : vector<8x128xf32>
    %cst_17 = arith.constant dense<0xFF800000> : vector<8xf32>
    %31 = vector.multi_reduction <maximumf>, %30, %cst_17 [1] : vector<8x128xf32> to vector<8xf32>
    %32 = vector.shape_cast %31 : vector<8xf32> to vector<8x1xf32>
    %33 = vector.broadcast %32 : vector<8x1xf32> to vector<8x128xf32>
    %34 = arith.subf %30, %33 : vector<8x128xf32>
    %35 = math.exp %34 : vector<8x128xf32>
    %cst_18 = arith.constant dense<0.000000e+00> : vector<8xf32>
    %36 = vector.multi_reduction <add>, %35, %cst_18 [1] : vector<8x128xf32> to vector<8xf32>
    %37 = vector.shape_cast %36 : vector<8xf32> to vector<8x1xf32>
    %38 = tpu.reciprocal %37 {approx = true} : vector<8x1xf32> -> vector<8x1xf32>
    %39 = vector.broadcast %38 : vector<8x1xf32> to vector<8x128xf32>
    %40 = arith.mulf %35, %39 : vector<8x128xf32>
    %c0_19 = arith.constant 0 : index
    %c0_20 = arith.constant 0 : index
    %41 = vector.load %arg8[%c0_19, %c0_20] : memref<8x128xf32, #tpu.memory_space<vmem>>, vector<8x128xf32>
    tpu.vector_store %arg8[%c0_19, %c0_20], %40 {strides = array<i32>} : memref<8x128xf32, #tpu.memory_space<vmem>>, vector<8x128xf32>,
    return
  }
  func.func @transform_0(%arg0: i32) -> (i32, i32) {
    %c0_i32 = arith.constant 0 : i32
    %c0_i32_0 = arith.constant 0 : i32
    return %arg0, %c0_i32 : i32, i32
  }
  func.func @transform_1(%arg0: i32) -> (i32, i32) {
    %c0_i32 = arith.constant 0 : i32
    %c0_i32_0 = arith.constant 0 : i32
    %c0_i32_1 = arith.constant 0 : i32
    return %c0_i32, %c0_i32_0 : i32, i32
  }
  func.func @transform_2(%arg0: i32) -> (i32, i32) {
    %c0_i32 = arith.constant 0 : i32
    %c0_i32_0 = arith.constant 0 : i32
    %c0_i32_1 = arith.constant 0 : i32
    return %c0_i32, %c0_i32_0 : i32, i32
  }
  func.func @transform_3(%arg0: i32) -> (i32, i32) {
    %c0_i32 = arith.constant 0 : i32
    %c0_i32_0 = arith.constant 0 : i32
    %c0_i32_1 = arith.constant 0 : i32
    return %c0_i32, %c0_i32_0 : i32, i32
  }
  func.func @transform_4(%arg0: i32) -> (i32, i32) {
    %c0_i32 = arith.constant 0 : i32
    %c0_i32_0 = arith.constant 0 : i32
    %c0_i32_1 = arith.constant 0 : i32
    return %c0_i32, %c0_i32_0 : i32, i32
  }
  func.func @transform_5(%arg0: i32) -> (i32, i32) {
    %c0_i32 = arith.constant 0 : i32
    %c0_i32_0 = arith.constant 0 : i32
    %c0_i32_1 = arith.constant 0 : i32
    return %c0_i32, %c0_i32_0 : i32, i32
  }
  func.func @transform_6(%arg0: i32) -> (i32, i32) {
    %c0_i32 = arith.constant 0 : i32
    %c0_i32_0 = arith.constant 0 : i32
    %c0_i32_1 = arith.constant 0 : i32
    return %c0_i32, %c0_i32_0 : i32, i32
  }
  func.func @transform_7(%arg0: i32) -> (i32, i32) {
    %c0_i32 = arith.constant 0 : i32
    %c0_i32_0 = arith.constant 0 : i32
    return %arg0, %c0_i32 : i32, i32
  }
}

</mosaic_0001>

<bundles_post_ra>
// kernel: tpu_custom_call.1
= control target key start
LH: loop header
LB: loop body
LE: loop exit
PB: predicated region body
PF: predicated region fallthrough
CT: control target
= control target key end

     0   :  { %12 = vsyncpa [#allocation3], 0  ;;  %s1610_s0 = inlined_call_operand.hbm [shape: f32[32,128], index: 0, kind: input, shape index: {}]   ;;  %s1611_s1 = inlined_call_operand.hbm [shape: bf16[128,128], index: 1, kind: input, shape index: {}]   ;;  %s1612_s2 = inlined_call_operand.vmem [shape: f32[1,128], index: 2, kind: input, shape index: {}]   ;;  %s1613_s3 = inlined_call_operand.hbm [shape: bf16[128,128], index: 3, kind: input, shape index: {}]   ;;  %s1614_s4 = inlined_call_operand.vmem [shape: f32[1,128], index: 4, kind: input, shape index: {}]   ;;  %s1615_s5 = inlined_call_operand.hbm [shape: bf16[128,128], index: 5, kind: input, shape index: {}]   ;;  %s1616_s6 = inlined_call_operand.vmem [shape: f32[1,128], index: 6, kind: input, shape index: {}]   ;;  %s1617_s7 = inlined_call_operand.hbm [shape: f32[32,128], index: 7, kind: output, shape index: {}]  }
   0x1   :  { %14 = vsyncpa [#allocation3 + $0x1], 0 }
   0x2   :  { %15 = vsyncpa [#allocation6], 0 }
   0x3   :  { %16 = vsyncpa [#allocation9], 0 }
   0x4   :  { %17 = vsyncpa [#allocation4], 0 }
   0x5   :  { %19 = vsyncpa [#allocation4 + $0x1], 0  ;;  %s1303_s24 = smov 0   ;;  %s1305_s25 = smov 0  }
   0x6   :  { %s1307_s26 = smov 0   ;;  %s1309_s27 = smov 0  }
   0x7 LB: > { %s1324_s28 = sadd.s32 4294967295, %s1252_s27   ;;  %s813_s29 = sadd.s32 4294967294, %s1252_s27   ;;  %s1252_s27 = sphi %s1309_s27, %s1642_s27   ;;  %s1248_s26 = sphi %s1307_s26, %s1641_s26   ;;  %s1244_s25 = sphi %s1305_s25, %s1640_s25   ;;  %s1240_s24 = sphi %s1303_s24, %s1639_s24  }
   0x8   : > { %p45_p0 = scmp.ne.s32.totalorder %s1244_s25, %s1240_s24  ;;  %p1618_p1 = scmp.eq.s32.totalorder %s1324_s28, 0 }
   0x9   : > { %p201_p3 = scmp.eq.s32.totalorder %s813_s29, 3  ;;  %p814_p5 = scmp.ge.s32.totalorder %s1252_s27, 1 }
   0xa   : > { %p1333_p4 = por %p1618_p1, %p45_p0  ;;  %p208_p7 = scmp.lt.s32.totalorder %s1252_s27, 5 }
   0xb   : > { %p1338_p6 = por %p201_p3, %p45_p0  ;;  %s1254_s10 = smov [#allocation5]  }
   0xc   : > { %s1622_s30 = scalar_select %p1333_p4, 1, 0 }
   0xd   : > { %s1623_s8 = scalar_select %p1338_p6, 1, 0 }
   0xe   : > { %p1343_p8 = pnand %p814_p5, %p208_p7  ;;  %s220_s11 = sshll.u32 %s1254_s10, 4  ;;  %s1347_s11 = int_to_ptr.vmem [resolvable:$true] %s220_s11 }
   0xf   : > { %1624 = sst [smem:[#allocation15_spill]] %s1623_s8  ;;  %s1255_s13 = smov [#allocation7]  }
  0x10   : > { %s1625_s9 = scalar_select %p1343_p8, 1, 0 }
  0x11   : > { %p963_p9 = pneg %p1343_p8  ;;  %s236_s14 = sshll.u32 %s1255_s13, 4  ;;  %s1357_s14 = int_to_ptr.vmem [resolvable:$true] %s236_s14 }
  0x12   : > { %s1256_s15 = smov [#allocation8]   ;;  %s1064_s19 = scalar_lea.hbm %s1611_s1, 1024 }
  0x13   : > { %p1353_p10 = pnand %p963_p9, %p1618_p1  ;;  %s1359_s16 = sshll.u32 %s1256_s15, 4  ;;  %s253_s16 = int_to_ptr.vmem [resolvable:$true] %s1359_s16 }
  0x14   : > { %p1065_p11 = scmp.ne.s32.totalorder %s1611_s1, %s1064_s19  ;;  %p1071_p3 = scmp.lt.u32.totalorder %s1064_s19, %s1611_s1 }
  0x15   : > { %p1369_p12 = pneg %p1353_p10 }
  0x17   : > { %p1067_p13 = pnand %p1369_p12, %p1065_p11 }
  0x19   : > { %p1068_p0 = pneg %p1067_p13 }
  0x1b   : > { %p1073_p5 = pnand %p1071_p3, %p1068_p0 }
  0x1d   : > { %1076 = shalt.err (!%p1073_p5)
}
  0x1e   : > { %s1077_s10 = scalar_lea.vmem %s1347_s11, 1024  ;;  %p1085_p2 = scmp.lt.s32.totalorder %s1347_s11, %s1347_s11 }
  0x1f   : > { %p1078_p7 = scmp.ne.s32.totalorder %s1347_s11, %s1077_s10  ;;  %p1086_p6 = scmp.lt.s32.totalorder %s1077_s10, %s1077_s10 }
  0x21   : > { %p1080_p9 = pnand %p1078_p7, %p1369_p12  ;;  %p1087_p11 = por %p1086_p6, %p1085_p2 }
  0x23   : > { %p1081_p1 = pneg %p1080_p9 }
  0x25   : > { %p1088_p13 = pnand %p1087_p11, %p1081_p1 }
  0x27   : > { %1091 = shalt.err (!%p1088_p13)
}
  0x28   : > { %s1257_s13 = smov 64   ;;  %s1258_s15 = smov 4  }
  0x29   : > { %966 = dma.hbm_to_vmem [thread:$0]  (!%p1353_p10), %s1611_s1, 1024, %s1347_s11, [#allocation6], %s1257_s13, %s1257_s13, %s1258_s15  }
  0x2a   : > { %s1092_s21 = scalar_lea.hbm %s1613_s3, 1024 }
  0x2b   : > { %p1093_p1 = scmp.ne.s32.totalorder %s1613_s3, %s1092_s21  ;;  %p1099_p0 = scmp.lt.u32.totalorder %s1092_s21, %s1613_s3 }
  0x2d   : > { %p1095_p2 = pnand %p1093_p1, %p1369_p12 }
  0x2f   : > { %p1096_p6 = pneg %p1095_p2 }
  0x31   : > { %p1101_p3 = pnand %p1099_p0, %p1096_p6 }
  0x33   : > { %1104 = shalt.err (!%p1101_p3)
}
  0x34   : > { %s1105_s11 = scalar_lea.vmem %s1357_s14, 1024  ;;  %p1113_p11 = scmp.lt.s32.totalorder %s1357_s14, %s1357_s14 }
  0x35   : > { %p1106_p5 = scmp.ne.s32.totalorder %s1357_s14, %s1105_s11  ;;  %p1114_p13 = scmp.lt.s32.totalorder %s1105_s11, %s1105_s11 }
  0x37   : > { %p1108_p7 = pnand %p1106_p5, %p1369_p12  ;;  %p1115_p1 = por %p1114_p13, %p1113_p11 }
  0x39   : > { %p1109_p9 = pneg %p1108_p7 }
  0x3b   : > { %p1116_p2 = pnand %p1115_p1, %p1109_p9 }
  0x3d   : > { %1119 = shalt.err (!%p1116_p2)
}
  0x3e   : > { %969 = dma.hbm_to_vmem [thread:$0]  (!%p1353_p10), %s1613_s3, 1024, %s1357_s14, [#allocation6], %s1257_s13, %s1257_s13, %s1258_s15  }
  0x3f   : > { %s1120_s20 = scalar_lea.hbm %s1615_s5, 1024 }
  0x40   : > { %p1121_p6 = scmp.ne.s32.totalorder %s1615_s5, %s1120_s20  ;;  %p1127_p5 = scmp.lt.u32.totalorder %s1120_s20, %s1615_s5 }
  0x42   : > { %p1123_p0 = pnand %p1121_p6, %p1369_p12 }
  0x44   : > { %p1124_p3 = pneg %p1123_p0 }
  0x46   : > { %p1129_p7 = pnand %p1127_p5, %p1124_p3 }
  0x48   : > { %1132 = shalt.err (!%p1129_p7)
}
  0x49   : > { %s1133_s11 = scalar_lea.vmem %s253_s16, 1024  ;;  %p1141_p1 = scmp.lt.s32.totalorder %s253_s16, %s253_s16 }
  0x4a   : > { %p1134_p9 = scmp.ne.s32.totalorder %s253_s16, %s1133_s11  ;;  %p1142_p2 = scmp.lt.s32.totalorder %s1133_s11, %s1133_s11 }
  0x4c   : > { %p1136_p11 = pnand %p1134_p9, %p1369_p12  ;;  %p1143_p4 = por %p1142_p2, %p1141_p1 }
  0x4e   : > { %p1137_p13 = pneg %p1136_p11 }
  0x50   : > { %p1144_p8 = pnand %p1143_p4, %p1137_p13 }
  0x52   : > { %1147 = shalt.err (!%p1144_p8)
}
  0x53   : > { %972 = dma.hbm_to_vmem [thread:$0]  (!%p1353_p10), %s1615_s5, 1024, %s253_s16, [#allocation9], %s1257_s13, %s1257_s13, %s1258_s15  }
  0x54   : > { %s1442_s22 = sadd.s32 1, %s1252_s27   ;;  %s32_s17 = sadd.s32 1, %s1248_s26 }
  0x55   : > { %s29_s12 = ssub.s32 %s1252_s27, %s1442_s22  ;;  %p39_p8 = scmp.ne.s32.totalorder %s1248_s26, %s1244_s25 }
  0x56   : > { %p30_p4 = scmp.eq.s32.totalorder %s29_s12, 0  ;;  %p40_p12 = scmp.eq.s32.totalorder %s1252_s27, 0 }
  0x57   : > { %p984_p6 = scmp.lt.s32.totalorder %s1252_s27, 4  ;;  %p1628_p3 = scmp.eq.s32.totalorder %s1324_s28, 3 }
  0x58   : > { %s1452_s18 = scalar_select %p30_p4, %s1248_s26, %s32_s17  }
  0x59   : > { %p41_p0 = por %p40_p12, %p39_p8  ;;  %p1456_p5 = por %p1628_p3, %p39_p8 }
  0x5a   : > { %s269_s20 = sand.u32 1, %s1248_s26   ;;  %s820_s21 = sshll.u32 %s1252_s27, 7 }
  0x5b   : > { %s819_s16 = sshll.u32 %s269_s20, 3  ;;  %s1465_s23 = scalar_lea.hbm %s1610_s0, %s820_s21 }
  0x5c   : > { %s273_s29 = scalar_lea.vmem [#allocation2], %s819_s16  ;;  %p1467_p10 = pnand %p984_p6, %p41_p0 }
  0x5d   : > { %s280_s10 = sshll.u32 %s273_s29, 4  ;;  %s270_s14 = scalar_lea.sflag [#allocation3], %s269_s20  ;;  %s1471_s10 = int_to_ptr.vmem [resolvable:$true] %s280_s10 }
  0x5e   : > { %s1148_s8 = scalar_lea.hbm %s1465_s23, 128  ;;  %p1150_p9 = pneg %p1467_p10 }
  0x5f   : > { %p1149_p7 = scmp.ne.s32.totalorder %s1465_s23, %s1148_s8  ;;  %s1153_s21 = scalar_lea.hbm %s1610_s0, 512 }
  0x60   : > { %p1154_p1 = scmp.lt.u32.totalorder %s1465_s23, %s1610_s0  ;;  %p1155_p2 = scmp.lt.u32.totalorder %s1153_s21, %s1148_s8 }
  0x61   : > { %p1151_p11 = pnand %p1150_p9, %p1149_p7  ;;  %p1157_p8 = scmp.lt.u32.totalorder %s1148_s8, %s1465_s23 }
  0x62   : > { %p1156_p4 = por %p1155_p2, %p1154_p1 }
  0x63   : > { %p1152_p13 = pneg %p1151_p11 }
  0x64   : > { %p1158_p12 = por %p1157_p8, %p1156_p4 }
  0x66   : > { %p1159_p6 = pnand %p1158_p12, %p1152_p13 }
  0x68   : > { %1162 = shalt.err (!%p1159_p6)
}
  0x69   : > { %s1163_s20 = scalar_lea.vmem %s1471_s10, 128  ;;  %s1259_s15 = smov [#allocation2]  }
  0x6a   : > { %p1164_p0 = scmp.ne.s32.totalorder %s1471_s10, %s1163_s20  ;;  %s1168_s29 = sshll.u32 %s1259_s15, 4  ;;  %s1169_s29 = int_to_ptr.vmem [resolvable:$false] %s1168_s29 }
  0x6b   : > { %s1170_s12 = scalar_lea.vmem %s1169_s29, 256  ;;  %p1171_p11 = scmp.lt.s32.totalorder %s1471_s10, %s1169_s29 }
  0x6c   : > { %p1166_p3 = pnand %p1164_p0, %p1150_p9  ;;  %p1172_p1 = scmp.lt.s32.totalorder %s1170_s12, %s1163_s20 }
  0x6e   : > { %p1167_p7 = pneg %p1166_p3  ;;  %p1173_p2 = por %p1172_p1, %p1171_p11 }
  0x70   : > { %p1174_p4 = pnand %p1173_p2, %p1167_p7 }
  0x72   : > { %1177 = shalt.err (!%p1174_p4)
}
  0x73   : > { %976 = dma.hbm_to_vmem [thread:$0]  (!%p1467_p10), %s1465_s23, 128, %s1471_s10, %s270_s14  }
  0x74   : > { %p1631_p13 = scmp.ne.s32.totalorder %s1625_s9, 0 }
  0x75   : > { %s1501_s8 = sand.u32 (!%p1631_p13), 1, %s1244_s25   ;;  %p1632_p9 = scmp.ne.s32.totalorder (!%p1631_p13), %s1622_s30, 0 }
  0x76   : > { %289 = sbr.rel (%p1631_p13) target bundleno = 1195 (0x4ab), region = 48  ;;  %s822_s17 = sshll.u32 (!%p1631_p13), %s1501_s8, 3 }
  0x77   : > { %s292_s21 = scalar_lea.sflag (!%p1631_p13), [#allocation3], %s1501_s8  ;;  %s1507_s16 = scalar_lea.vmem (!%p1631_p13), [#allocation2], %s822_s17 }
  0x7d   : > { %1223 = dma.done.wait (%p1632_p9), %s292_s21, 128  }
  0x7e   : > { %1225 = vsyncadd (%p1632_p9), %s292_s21, 4294967168  ;;  %p1633_p10 = scmp.eq.s32.totalorder %s1324_s28, 0 }
  0x80   : > { %1227 = dma.done.wait (%p1633_p10), [#allocation6], 2048   ;;  %p1634_p8 = pmov %p1633_p10 }
  0x82   : > { %1229 = vsyncadd (%p1634_p8), [#allocation6], 4294965248  ;;  %p1635_p12 = pmov %p1634_p8 }
  0x83   : > { %p1636_p6 = pmov %p1634_p8 }
  0x84   : > { %1231 = dma.done.wait (%p1635_p12), [#allocation9], 1024  }
  0x85   : > { %1233 = vsyncadd (%p1636_p6), [#allocation9], 4294966272  ;;  %v1260_v0 = vmov 0.0   ;;  %vm1261_vm0 = vmmov 0   ;;  %v1028_v1 = vld [vmem:[#allocation5] sm:$0xff]   ;;  %v1029_v2 = vld [vmem:[#allocation5 + $0x8] sm:$0xff]  }
  0x86   : > { %887 = vmatprep.subr.bf16.mxu0 %v1260_v0  ;;  %903 = vmatprep.mubr.msk.bf16.mxu0 %vm1261_vm0, %v1260_v0  ;;  %v1030_v3 = vld [vmem:[#allocation5 + $0x10] sm:$0xff]   ;;  %v1031_v4 = vld [vmem:[#allocation5 + $0x18] sm:$0xff]   ;;  %v1032_v5 = vld [vmem:[#allocation5 + $0x20] sm:$0xff]   ;;  %s857_s13 = sshll.u32 %s1324_s28, 7  ;;  %s337_s20 = scalar_lea.vmem [#allocation10], %s822_s17 }
  0x87   : > { %907 = vmatprep.subr.bf16.mxu1 %v1260_v0  ;;  %923 = vmatprep.mubr.msk.bf16.mxu1 %vm1261_vm0, %v1260_v0  ;;  %v1033_v6 = vld [vmem:[#allocation5 + $0x28] sm:$0xff]   ;;  %v1034_v7 = vld [vmem:[#allocation5 + $0x30] sm:$0xff]   ;;  %v1035_v8 = vld [vmem:[#allocation5 + $0x38] sm:$0xff]   ;;  %s714_s15 = sshll.u32 %s337_s20, 4  ;;  %s1567_s21 = scalar_lea.hbm %s1617_s7, %s857_s13  ;;  %s1569_s15 = int_to_ptr.vmem [resolvable:$true] %s714_s15 }
  0x88   : > { %888 = vmatpush3.bf16.msra.mxu0 %v1028_v1  ;;  %v339_v9 = vld [vmem:[%s1507_s16] sm:$0xff]  ;;  %v1036_v11 = vld [vmem:[#allocation7] sm:$0xff]   ;;  %v1037_v12 = vld [vmem:[#allocation7 + $0x8] sm:$0xff]   ;;  %s701_s16 = scalar_lea.sflag [#allocation4], %s1501_s8  ;;  %s1178_s30 = scalar_lea.vmem %s1569_s15, 128 }
  0x89   : > { %889 = vmatprep.subr.bf16.mxu0 %v1260_v0  ;;  %v357_v10 = vpack.c.bf16 %v339_v9, %v339_v9  ;;  %908 = vmatpush3.bf16.msra.mxu1 %v1036_v11  ;;  %v1038_v13 = vld [vmem:[#allocation7 + $0x10] sm:$0xff]   ;;  %v1039_v14 = vld [vmem:[#allocation7 + $0x18] sm:$0xff]   ;;  %v1040_v15 = vld [vmem:[#allocation7 + $0x20] sm:$0xff]   ;;  %p1179_p0 = scmp.ne.s32.totalorder %s1569_s15, %s1178_s30  ;;  %s1262_s28 = smov [#allocation10]  }
  0x8a   : > { %909 = vmatprep.subr.bf16.mxu1 %v1260_v0  ;;  %v1041_v16 = vld [vmem:[#allocation7 + $0x28] sm:$0xff]   ;;  %v1042_v17 = vld [vmem:[#allocation7 + $0x30] sm:$0xff]   ;;  %v1043_v18 = vld [vmem:[#allocation7 + $0x38] sm:$0xff]   ;;  %s1182_s17 = sshll.u32 %s1262_s28, 4  ;;  %s1183_s17 = int_to_ptr.vmem [resolvable:$false] %s1182_s17 }
  0x8b   : > { %v827_v19 = vld [vmem:[%s1612_s2] ss:$0 sm:$0xff]  ;;  %v1044_v31 = vld [vmem:[#allocation8] sm:$0xff]   ;;  %v1045_v32 = vld [vmem:[#allocation8 + $0x8] sm:$0xff]   ;;  %p1180_p3 = pnand %p1179_p0, %p1456_p5  ;;  %s1184_s9 = scalar_lea.vmem %s1183_s17, 256 }
  0x8c   : > { %890 = vmatpush3.bf16.msra.mxu0 %v1029_v2  ;;  %v1046_v33 = vld [vmem:[#allocation8 + $0x10] sm:$0xff]   ;;  %v1047_v34 = vld [vmem:[#allocation8 + $0x18] sm:$0xff]   ;;  %v1048_v35 = vld [vmem:[#allocation8 + $0x20] sm:$0xff]   ;;  %p1185_p11 = scmp.lt.s32.totalorder %s1569_s15, %s1183_s17  ;;  %p1186_p1 = scmp.lt.s32.totalorder %s1184_s9, %s1178_s30 }
  0x8d   : > { %891 = vmatprep.subr.bf16.mxu0 %v1260_v0  ;;  %910 = vmatpush3.bf16.msra.mxu1 %v1037_v12  ;;  %v1049_v36 = vld [vmem:[#allocation8 + $0x28] sm:$0xff]   ;;  %v1050_v37 = vld [vmem:[#allocation8 + $0x30] sm:$0xff]   ;;  %v1051_v38 = vld [vmem:[#allocation8 + $0x38] sm:$0xff]   ;;  %p1181_p7 = pneg %p1180_p3 }
  0x8e   : > { %911 = vmatprep.subr.bf16.mxu1 %v1260_v0  ;;  %v837_v39 = vld [vmem:[%s1614_s4] ss:$0 sm:$0xff]  ;;  %p1187_p2 = por %p1186_p1, %p1185_p11 }
  0x8f   : > { %v847_v51 = vld [vmem:[%s1616_s6] ss:$0 sm:$0xff] }
  0x90   : > { %892 = vmatpush3.bf16.msra.mxu0 %v1030_v3  ;;  %p1188_p4 = pnand %p1187_p2, %p1181_p7 }
  0x91   : > { %893 = vmatprep.subr.bf16.mxu0 %v1260_v0  ;;  %912 = vmatpush3.bf16.msra.mxu1 %v1038_v13 }
  0x92   : > { %913 = vmatprep.subr.bf16.mxu1 %v1260_v0 }
  0x94   : > { %894 = vmatpush3.bf16.msra.mxu0 %v1031_v4 }
  0x95   : > { %895 = vmatprep.subr.bf16.mxu0 %v1260_v0  ;;  %914 = vmatpush3.bf16.msra.mxu1 %v1039_v14 }
  0x96   : > { %915 = vmatprep.subr.bf16.mxu1 %v1260_v0 }
  0x98   : > { %896 = vmatpush3.bf16.msra.mxu0 %v1032_v5 }
  0x99   : > { %897 = vmatprep.subr.bf16.mxu0 %v1260_v0  ;;  %916 = vmatpush3.bf16.msra.mxu1 %v1040_v15 }
  0x9a   : > { %917 = vmatprep.subr.bf16.mxu1 %v1260_v0 }
  0x9c   : > { %898 = vmatpush3.bf16.msra.mxu0 %v1033_v6 }
  0x9d   : > { %899 = vmatprep.subr.bf16.mxu0 %v1260_v0  ;;  %918 = vmatpush3.bf16.msra.mxu1 %v1041_v16 }
  0x9e   : > { %919 = vmatprep.subr.bf16.mxu1 %v1260_v0 }
  0xa0   : > { %900 = vmatpush3.bf16.msra.mxu0 %v1034_v7 }
  0xa1   : > { %901 = vmatprep.subr.bf16.mxu0 %v1260_v0  ;;  %920 = vmatpush3.bf16.msra.mxu1 %v1042_v17 }
  0xa2   : > { %921 = vmatprep.subr.bf16.mxu1 %v1260_v0 }
  0xa4   : > { %902 = vmatpush3.bf16.msra.mxu0 %v1035_v8 }
  0xa5   : > { %927 = vmatprep.subr.bf16.mxu0 %v1260_v0  ;;  %922 = vmatpush3.bf16.msra.mxu1 %v1043_v18 }
  0xa7   : > { %904 = vmatmul.mubr.bf16.vlgmr.msra.gmra.mrb[0].mxu0 %v357_v10 }
  0xa8   : > { %943 = vmatprep.mubr.msk.bf16.mxu0 %vm1261_vm0, %v1260_v0  ;;  %928 = vmatpush3.bf16.msra.mxu0 %v1044_v31 }
  0xa9   : > { %929 = vmatprep.subr.bf16.mxu0 %v1260_v0 }
  0xac   : > { %930 = vmatpush3.bf16.msra.mxu0 %v1045_v32 }
  0xad   : > { %931 = vmatprep.subr.bf16.mxu0 %v1260_v0 }
  0xb0   : > { %932 = vmatpush3.bf16.msra.mxu0 %v1046_v33 }
  0xb1   : > { %933 = vmatprep.subr.bf16.mxu0 %v1260_v0 }
  0xb4   : > { %934 = vmatpush3.bf16.msra.mxu0 %v1047_v34 }
  0xb5   : > { %935 = vmatprep.subr.bf16.mxu0 %v1260_v0 }
  0xb8   : > { %936 = vmatpush3.bf16.msra.mxu0 %v1048_v35 }
  0xb9   : > { %937 = vmatprep.subr.bf16.mxu0 %v1260_v0 }
  0xbc   : > { %938 = vmatpush3.bf16.msra.mxu0 %v1049_v36 }
  0xbd   : > { %939 = vmatprep.subr.bf16.mxu0 %v1260_v0 }
  0xc0   : > { %940 = vmatpush3.bf16.msra.mxu0 %v1050_v37 }
  0xc1   : > { %941 = vmatprep.subr.bf16.mxu0 %v1260_v0 }
  0xc4   : > { %942 = vmatpush3.bf16.msra.mxu0 %v1051_v38 }
 0x17a   : > { %v446_v20 = vpop.f32.mrb[0].mxu0 }
 0x17b   : > { %v447_v21 = vadd.f32 %v827_v19, %v446_v20  ;;  %v905_v22 = vpop.f32.mrb[1].mxu0 }
 0x17c   : > { %v449_v23 = vpop.f32.mrb[2].mxu0 }
 0x17d   : > { %v836_v24 = vmul.f32 -1.442695, %v447_v21  ;;  %v906_v25 = vpop.f32.mrb[3].mxu0 }
 0x17f   : > { %1052 = vpow2.f32 %v836_v24 }
 0x189   : > { %v1053_v26 = vpop.eup %1052 }
 0x18a   : > { %v455_v27 = vadd.f32 1.0, %v1053_v26 }
 0x18c   : > { %1054 = vrcp.f32 %v455_v27 }
 0x196   : > { %v1055_v28 = vpop.eup %1054 }
 0x197   : > { %v458_v29 = vmul.f32 %v1055_v28, %v447_v21 }
 0x199   : > { %v476_v30 = vpack.c.bf16 %v458_v29, %v458_v29 }
 0x19b   : > { %924 = vmatmul.mubr.bf16.vlgmr.msra.gmra.mrb[0].mxu1 %v476_v30 }
 0x26e   : > { %v565_v40 = vpop.f32.mrb[0].mxu1 }
 0x26f   : > { %v566_v41 = vadd.f32 %v837_v39, %v565_v40  ;;  %v925_v42 = vpop.f32.mrb[1].mxu1 }
 0x270   : > { %v568_v43 = vpop.f32.mrb[2].mxu1 }
 0x271   : > { %v846_v44 = vmul.f32 -1.442695, %v566_v41  ;;  %v926_v45 = vpop.f32.mrb[3].mxu1 }
 0x273   : > { %1056 = vpow2.f32 %v846_v44 }
 0x27d   : > { %v1057_v46 = vpop.eup %1056 }
 0x27e   : > { %v574_v47 = vadd.f32 1.0, %v1057_v46 }
 0x280   : > { %1058 = vrcp.f32 %v574_v47 }
 0x28a   : > { %v1059_v48 = vpop.eup %1058 }
 0x28b   : > { %v577_v49 = vmul.f32 %v1059_v48, %v566_v41 }
 0x28d   : > { %v595_v50 = vpack.c.bf16 %v577_v49, %v577_v49 }
 0x28f   : > { %944 = vmatmul.mubr.bf16.vlgmr.msra.gmra.mrb[4].mxu0 %v595_v50 }
 0x362   : > { %v684_v52 = vpop.f32.mrb[4].mxu0 }
 0x363   : > { %v685_v53 = vadd.f32 %v847_v51, %v684_v52  ;;  %v945_v54 = vpop.f32.mrb[5].mxu0 }
 0x364   : > { %v687_v55 = vpop.f32.mrb[6].mxu0 }
 0x365   : > { %690 = vmax.xlane.f32.xlu0 %v685_v53  ;;  %v946_v56 = vpop.f32.mrb[7].mxu0 }
 0x3f2   : > { %v691_v57 = vpop.xlane.xlu0 %690 }
 0x3f3   : > { %v692_v58 = vsub.f32 %v685_v53, %v691_v57 }
 0x3f5   : > { %v693_v59 = vmul.f32 1.442695, %v692_v58 }
 0x3f7   : > { %1060 = vpow2.f32 %v693_v59 }
 0x401   : > { %v1061_v60 = vpop.eup %1060 }
 0x402   : > { %695 = vadd.xlane.f32.xlu0 %v1061_v60 }
 0x48f   : > { %v696_v61 = vpop.xlane.xlu0 %695 }
 0x490   : > { %1062 = vrcp.f32 %v696_v61 }
 0x49a   : > { %v1063_v62 = vpop.eup %1062 }
 0x49b   : > { %v698_v63 = vmul.f32 %v1063_v62, %v1061_v60 }
 0x49d   : > { %699 = vst [vmem:[%s337_s20] sm:$0xff] %v698_v63 }
 0x49e   : > { %1191 = shalt.err (!%p1188_p4)
}
 0x49f   : > { %s1192_s8 = scalar_lea.hbm %s1567_s21, 128  ;;  %s1196_s11 = scalar_lea.hbm %s1617_s7, 512 }
 0x4a0   : > { %p1193_p13 = scmp.ne.s32.totalorder %s1567_s21, %s1192_s8  ;;  %p1197_p8 = scmp.lt.u32.totalorder %s1567_s21, %s1617_s7 }
 0x4a1   : > { %p1198_p12 = scmp.lt.u32.totalorder %s1196_s11, %s1192_s8  ;;  %p1200_p0 = scmp.lt.u32.totalorder %s1192_s8, %s1567_s21 }
 0x4a2   : > { %p1194_p9 = pnand %p1193_p13, %p1456_p5 }
 0x4a3   : > { %p1199_p6 = por %p1198_p12, %p1197_p8 }
 0x4a4   : > { %p1195_p10 = pneg %p1194_p9 }
 0x4a5   : > { %p1201_p3 = por %p1200_p0, %p1199_p6 }
 0x4a7   : > { %p1202_p7 = pnand %p1201_p3, %p1195_p10 }
 0x4a9   : > { %1205 = shalt.err (!%p1202_p7)
}
 0x4aa   : > { %961 = dma.vmem_to_hbm [thread:$0]  (%p1456_p5), %s1569_s15, 128, %s1567_s21, %s701_s16  }
 0x4ab PF: > { %s1637_s20 = sld [smem:[#allocation15_spill]]  ;;  %p988_p11 = scmp.ge.s32.totalorder %s1252_s27, 2 }
 0x4ac   : > { %s726_s29 = sand.u32 1, %s1240_s24  }
 0x4ad   : > { %s727_s12 = scalar_lea.sflag [#allocation4], %s726_s29 }
 0x4b1   : > { %p1638_p1 = scmp.ne.s32.totalorder %s1637_s20, 0 }
 0x4b3   : > { %p978_p2 = pnand %p988_p11, %p1638_p1 }
 0x4b5   : > { %1235 = dma.done.wait (!%p978_p2), %s727_s12, 128  }
 0x4b6   : > { %1237 = vsyncadd (!%p978_p2), %s727_s12, 4294967168  ;;  %p22_p4 = scmp.ge.s32.totalorder %s1442_s22, 6   ;;  %s1639_s24 = smov %s1244_s25 }
 0x4b7   : > { %s1640_s25 = smov %s1248_s26  ;;  %s1641_s26 = smov %s1452_s18 }
 0x4b8   : > { %s1642_s27 = smov %s1442_s22  ;;  %24 = sbr.rel (!%p22_p4) target bundleno = 7 (0x7), region = 105 }
 0x4bf   :  { %732 = vsyncpa [#allocation3], 1 }
 0x4c0   :  { %734 = vsyncpa [#allocation3 + $0x1], 1 }
 0x4c1   :  { %735 = vsyncpa [#allocation6], 1 }
 0x4c2   :  { %736 = vsyncpa [#allocation9], 1 }
 0x4c3   :  { %737 = vsyncpa [#allocation4], 1 }
 0x4c4   :  { %739 = vsyncpa [#allocation4 + $0x1], 1 }

</bundles_post_ra>
